<compile_context>
chip_gen: v7x
topology: tpu7x:2x2x1
jax: 0.10.0
libtpu: 0.0.40
codegen_flags: <defaults>
</compile_context>

<pallas_src>
import jax
import jax.numpy as jnp
import numpy as np
from jax.experimental import pallas as pl
from jax.experimental.pallas import tpu as pltpu


def attention_kernel(x_ref, w_ref, o_ref):
    # x_ref: (TB, S, H), w_ref: (1, H), o_ref: (TB, H)

    # Single f32 cast of the input slab, reused below (no-op if already f32).
    x = x_ref[...].astype(jnp.float32)                    # (TB, S, H)
    w = w_ref[...].astype(jnp.float32)                    # (1, H)

    # attention_scores = x @ w on the VPU (multiply + lane reduce over H);
    # an (S, H) x (H, 1) matmul would waste the MXU and its result FIFO.
    scores = jnp.sum(x * w, axis=-1, keepdims=True)       # (TB, S, 1)

    # Numerically stable softmax over the sequence axis (axis=1), denominator
    # folded into one reciprocal at the end.
    m = jnp.max(scores, axis=1, keepdims=True)            # (TB, 1, 1)
    e = jnp.exp(scores - m)                               # (TB, S, 1)
    denom = jnp.sum(e, axis=1)                            # (TB, 1)

    # Unnormalized attention-weighted reduction over seq, then a single
    # reciprocal (EUP slot) + (TB, H) scale instead of S per-row divides.
    attended = jnp.sum(x * e, axis=1)                     # (TB, H)
    inv = pl.reciprocal(denom, approx=True)               # (TB, 1)
    o_ref[...] = (attended * inv).astype(o_ref.dtype)


def attention_forward(x, w, *, block_b=None,
                      vmem_limit_bytes=48 * 1024 * 1024,
                      input_vmem_budget=16 * 1024 * 1024):
    """x: (B, S, H), w: (H, 1) -> (B, H).  Matches Attention.forward."""
    B, S, H = x.shape
    # Present the weights as a lane-dense (1, H) row for the in-kernel
    # broadcast multiply (plain XLA reshape, outside the kernel).
    w_row = jnp.reshape(w, (1, H))

    # Pick the batch tile so the double-buffered (TB, S, H) input slab stays
    # within a conservative VMEM budget (safe on v7x's smaller VMEM, while
    # still giving 512+ row tiles for small S*H on v5e/v6e).
    if block_b is None:
        itemsize = np.dtype(x.dtype).itemsize
        bytes_per_batch_row = 2 * S * H * itemsize        # 2x = double buffer
        block_b = max(1, input_vmem_budget // bytes_per_batch_row)
        block_b = min(block_b, 1024)
    if block_b >= B:
        block_b = B                                       # single grid step
    else:
        block_b = max(8, (block_b // 8) * 8)              # sublane-dense tiles
    # TODO(synk): for very long S (block_b forced to 8 and still over budget),
    # tile the sequence axis with online-softmax accumulation to bound VMEM.

    grid_b = pl.cdiv(B, block_b)
    b_pad = grid_b * block_b
    if b_pad != B:
        # Zero-padded rows yield a uniform softmax over zeros -> zero output;
        # they are sliced off below.
        x = jnp.pad(x, ((0, b_pad - B), (0, 0), (0, 0)))

    out = pl.pallas_call(
        attention_kernel,
        out_shape=jax.ShapeDtypeStruct((b_pad, H), x.dtype),
        grid_spec=pltpu.PrefetchScalarGridSpec(
            num_scalar_prefetch=0,
            grid=(grid_b,),
            in_specs=[
                pl.BlockSpec((block_b, S, H), lambda b: (b, 0, 0)),
                pl.BlockSpec((1, H), lambda b: (0, 0)),
            ],
            out_specs=pl.BlockSpec((block_b, H), lambda b: (b, 0)),
        ),
        compiler_params=pltpu.CompilerParams(
            dimension_semantics=("parallel",),
            vmem_limit_bytes=vmem_limit_bytes,
        ),
    )(x, w_row)
    return out[:B]


def attention_reference(x, w):
    scores = jnp.matmul(x, w)                             # (B, S, 1)
    p = jax.nn.softmax(scores, axis=1)                    # softmax over seq
    return jnp.sum(x * p, axis=1)                         # (B, H)


if __name__ == "__main__":
    batch, seq, hidden = 2, 8, 32

    key = jax.random.PRNGKey(0)
    kx, kw = jax.random.split(key)

    x = jax.random.normal(kx, (batch, seq, hidden), dtype=jnp.float32)

    # Deterministic xavier_uniform_-style init for attention_weights (H, 1):
    # bound = sqrt(6 / (fan_in + fan_out)) = sqrt(6 / (hidden + 1))
    bound = float(np.sqrt(6.0 / (hidden + 1)))
    w = jax.random.uniform(kw, (hidden, 1), dtype=jnp.float32,
                           minval=-bound, maxval=bound)

    out = jax.block_until_ready(attention_forward(x, w))
    ref = attention_reference(x, w)

    # Tolerance accounts for the approximate EUP reciprocal used for the
    # softmax normalization; real bugs would be orders of magnitude larger.
    np.testing.assert_allclose(np.asarray(out), np.asarray(ref),
                               rtol=5e-3, atol=5e-3)

    print("KERNEL_OK")
</pallas_src>

<mosaic_0001>
module attributes {stable_mosaic.version = 11 : i64} {
  func.func @attention_kernel(%arg0: i32, %arg1: memref<2x8x32xf32, #tpu.memory_space<vmem>>, %arg2: memref<1x32xf32, #tpu.memory_space<vmem>>, %arg3: memref<2x32xf32, #tpu.memory_space<vmem>>) attributes {dimension_semantics = [#tpu.dimension_semantics<parallel>], iteration_bounds = array<i64: 1>, scalar_prefetch = 0 : i64, scratch_operands = 0 : i64, tpu.core_type = #tpu.core_type<tc>, window_params = [{transform_indices = @transform_0, window_bounds = array<i64: 2, 8, 32>}, {pipeline_mode = #tpu.pipeline_mode<synchronous>, transform_indices = @transform_1, window_bounds = array<i64: 1, 32>}, {transform_indices = @transform_2, window_bounds = array<i64: 2, 32>}]} {
    %c0 = arith.constant 0 : index
    %c0_0 = arith.constant 0 : index
    %c0_1 = arith.constant 0 : index
    %0 = vector.load %arg1[%c0, %c0_0, %c0_1] : memref<2x8x32xf32, #tpu.memory_space<vmem>>, vector<2x8x32xf32>
    %c0_2 = arith.constant 0 : index
    %c0_3 = arith.constant 0 : index
    %1 = vector.load %arg2[%c0_2, %c0_3] : memref<1x32xf32, #tpu.memory_space<vmem>>, vector<1x32xf32>
    %2 = vector.shape_cast %1 : vector<1x32xf32> to vector<1x1x32xf32>
    %3 = vector.broadcast %2 : vector<1x1x32xf32> to vector<2x8x32xf32>
    %4 = arith.mulf %0, %3 : vector<2x8x32xf32>
    %cst = arith.constant dense<0.000000e+00> : vector<2x8xf32>
    %5 = vector.multi_reduction <add>, %4, %cst [2] : vector<2x8x32xf32> to vector<2x8xf32>
    %6 = vector.shape_cast %5 : vector<2x8xf32> to vector<2x8x1xf32>
    %cst_4 = arith.constant dense<0xFF800000> : vector<2x1xf32>
    %7 = vector.multi_reduction <maximumf>, %6, %cst_4 [1] : vector<2x8x1xf32> to vector<2x1xf32>
    %8 = vector.shape_cast %7 : vector<2x1xf32> to vector<2x1x1xf32>
    %9 = vector.broadcast %8 : vector<2x1x1xf32> to vector<2x8x1xf32>
    %10 = arith.subf %6, %9 : vector<2x8x1xf32>
    %11 = math.exp %10 : vector<2x8x1xf32>
    %cst_5 = arith.constant dense<0.000000e+00> : vector<2x1xf32>
    %12 = vector.multi_reduction <add>, %11, %cst_5 [1] : vector<2x8x1xf32> to vector<2x1xf32>
    %13 = vector.broadcast %11 : vector<2x8x1xf32> to vector<2x8x32xf32>
    %14 = arith.mulf %0, %13 : vector<2x8x32xf32>
    %cst_6 = arith.constant dense<0.000000e+00> : vector<2x32xf32>
    %15 = vector.multi_reduction <add>, %14, %cst_6 [1] : vector<2x8x32xf32> to vector<2x32xf32>
    %16 = tpu.reciprocal %12 {approx = true} : vector<2x1xf32> -> vector<2x1xf32>
    %17 = vector.broadcast %16 : vector<2x1xf32> to vector<2x32xf32>
    %18 = arith.mulf %15, %17 : vector<2x32xf32>
    %c0_7 = arith.constant 0 : index
    %c0_8 = arith.constant 0 : index
    %19 = vector.load %arg3[%c0_7, %c0_8] : memref<2x32xf32, #tpu.memory_space<vmem>>, vector<2x32xf32>
    tpu.vector_store %arg3[%c0_7, %c0_8], %18 {strides = array<i32>} : memref<2x32xf32, #tpu.memory_space<vmem>>, vector<2x32xf32>,
    return
  }
  func.func @transform_0(%arg0: i32) -> (i32, i32, i32) {
    %c0_i32 = arith.constant 0 : i32
    %c0_i32_0 = arith.constant 0 : i32
    %c0_i32_1 = arith.constant 0 : i32
    return %arg0, %c0_i32, %c0_i32_0 : i32, i32, i32
  }
  func.func @transform_1(%arg0: i32) -> (i32, i32) {
    %c0_i32 = arith.constant 0 : i32
    %c0_i32_0 = arith.constant 0 : i32
    %c0_i32_1 = arith.constant 0 : i32
    return %c0_i32, %c0_i32_0 : i32, i32
  }
  func.func @transform_2(%arg0: i32) -> (i32, i32) {
    %c0_i32 = arith.constant 0 : i32
    %c0_i32_0 = arith.constant 0 : i32
    return %arg0, %c0_i32 : i32, i32
  }
}

</mosaic_0001>

<bundles_post_ra>
// kernel: tpu_custom_call.1
= control target key start
LH: loop header
LB: loop body
LE: loop exit
PB: predicated region body
PF: predicated region fallthrough
CT: control target
= control target key end

     0   :  { %7 = vsyncpa [#allocation3], 0  ;;  %s227_s0 = inlined_call_operand.hbm [shape: f32[2,8,32], index: 0, kind: input, shape index: {}]   ;;  %s228_s1 = inlined_call_operand.vmem [shape: f32[1,32], index: 1, kind: input, shape index: {}]   ;;  %s229_s2 = inlined_call_operand.hbm [shape: f32[2,32], index: 2, kind: output, shape index: {}]  }
   0x1   :  { %8 = vsyncpa [#allocation4], 0  ;;  %s177_s9 = smov [#allocation2]   ;;  %s129_s13 = scalar_lea.hbm %s227_s0, 256 }
   0x2   :  { %s14_s10 = sshll.u32 %s177_s9, 4  ;;  %p130_p0 = scmp.ne.s32.totalorder %s227_s0, %s129_s13  ;;  %s15_s10 = int_to_ptr.vmem [resolvable:$true] %s14_s10 }
   0x3   :  { %p133_p1 = scmp.lt.u32.totalorder %s129_s13, %s227_s0 }
   0x5   :  { %p135_p2 = pnand %p133_p1, %p130_p0 }
   0x7   :  { %138 = shalt.err (!%p135_p2)
}
   0x8   :  { %s139_s18 = scalar_lea.vmem %s15_s10, 256  ;;  %p144_p4 = scmp.lt.s32.totalorder %s15_s10, %s15_s10 }
   0x9   :  { %p140_p3 = scmp.ne.s32.totalorder %s15_s10, %s139_s18  ;;  %p145_p5 = scmp.lt.s32.totalorder %s139_s18, %s139_s18 }
   0xb   :  { %p146_p6 = por %p145_p5, %p144_p4 }
   0xd   :  { %p147_p7 = pnand %p146_p6, %p140_p3 }
   0xf   :  { %150 = shalt.err (!%p147_p7)
}
  0x10   :  { %s178_s19 = smov 128   ;;  %s179_s20 = smov 8  }
  0x11   :  { %20 = dma.hbm_to_vmem [thread:$0]  %s227_s0, 256, %s15_s10, [#allocation3], %s178_s19, %s178_s19, %s179_s20  }
  0x12   :  { %173 = dma.done.wait [#allocation3], 256  }
  0x13   :  { %174 = vsyncadd [#allocation3], 4294967040  ;;  %v26_v0 = vld [vmem:[#allocation2] sm:$0xff]  ;;  %vm37_vm0 = vcmask 261120   ;;  %v27_v2 = vld [vmem:[#allocation2 + $0x8] sm:$0xff]  ;;  %s180_s0 = smov [#allocation5]  }
  0x14   :  { %v116_v1 = vld [vmem:[%s228_s1] ss:$0 sm:$0xff]  ;;  %s107_s1 = sshll.u32 %s180_s0, 4  ;;  %vm96_vm1 = vcmask 1041409   ;;  %vm99_vm2 = vcmask 254976   ;;  %s108_s1 = int_to_ptr.vmem [resolvable:$true] %s107_s1 }
  0x15   :  { %v35_v3 = vmul.f32 %v116_v1, %v26_v0  ;;  %v36_v4 = vmul.f32 %v116_v1, %v27_v2  ;;  %s151_s25 = scalar_lea.vmem %s108_s1, 32  ;;  %p156_p9 = scmp.lt.s32.totalorder %s108_s1, %s108_s1 }
  0x16   :  { %p152_p8 = scmp.ne.s32.totalorder %s108_s1, %s151_s25  ;;  %p157_p10 = scmp.lt.s32.totalorder %s151_s25, %s151_s25 }
  0x17   :  { %v38_v5 = vsel %vm37_vm0, %v35_v3, 0.0  ;;  %v41_v6 = vsel %vm37_vm0, %v36_v4, 0.0 }
  0x18   :  { %39 = vadd.xlane.f32.xlu0 %v38_v5  ;;  %p158_p11 = por %p157_p10, %p156_p9 }
  0x1a   :  { %p159_p12 = pnand %p158_p11, %p152_p8 }
  0x1c   :  { %42 = vadd.xlane.f32.xlu0 %v41_v6 }
  0xa5   :  { %v40_v7 = vpop.xlane.xlu0 %39 }
  0xa6   :  { %v44_v8 = vrot.slane %v40_v7, 4 }
  0xa8   :  { %v45_v9 = vmax.f32 %v40_v7, %v44_v8 }
  0xa9   :  { %v43_v10 = vpop.xlane.xlu0 %42 }
  0xaa   :  { %v46_v11 = vrot.slane %v45_v9, 2  ;;  %v50_v12 = vrot.slane %v43_v10, 4 }
  0xac   :  { %v47_v13 = vmax.f32 %v45_v9, %v46_v11  ;;  %v51_v14 = vmax.f32 %v43_v10, %v50_v12 }
  0xae   :  { %v48_v15 = vrot.slane %v47_v13, 1  ;;  %v52_v16 = vrot.slane %v51_v14, 2 }
  0xb0   :  { %v49_v17 = vmax.f32 %v47_v13, %v48_v15  ;;  %v53_v18 = vmax.f32 %v51_v14, %v52_v16 }
  0xb2   :  { %v56_v19 = vsub.f32 %v40_v7, %v49_v17  ;;  %v54_v20 = vrot.slane %v53_v18, 1 }
  0xb4   :  { %v58_v21 = vmul.f32 1.442695, %v56_v19  ;;  %v55_v22 = vmax.f32 %v53_v18, %v54_v20 }
  0xb6   :  { %121 = vpow2.f32 %v58_v21  ;;  %v57_v23 = vsub.f32 %v43_v10, %v55_v22 }
  0xb8   :  { %v60_v24 = vmul.f32 1.442695, %v57_v23 }
  0xba   :  { %123 = vpow2.f32 %v60_v24 }
  0xc0   :  { %v122_v25 = vpop.eup %121 }
  0xc1   :  { %v62_v26 = vrot.slane %v122_v25, 4  ;;  %v74_v27 = vmul.f32 %v122_v25, %v26_v0 }
  0xc3   :  { %v63_v28 = vadd.f32 %v122_v25, %v62_v26  ;;  %v76_v29 = vsel %vm37_vm0, %v74_v27, 0.0 }
  0xc4   :  { %v124_v30 = vpop.eup %123  ;;  %v77_v34 = vrot.slane %v76_v29, 4 }
  0xc5   :  { %v64_v31 = vrot.slane %v63_v28, 2  ;;  %v68_v32 = vrot.slane %v124_v30, 4  ;;  %v75_v33 = vmul.f32 %v124_v30, %v27_v2 }
  0xc6   :  { %v78_v41 = vadd.f32 %v77_v34, %v76_v29 }
  0xc7   :  { %v65_v35 = vadd.f32 %v64_v31, %v63_v28  ;;  %v69_v36 = vadd.f32 %v124_v30, %v68_v32  ;;  %v83_v37 = vsel %vm37_vm0, %v75_v33, 0.0 }
  0xc8   :  { %v84_v38 = vrot.slane %v83_v37, 4  ;;  %v79_v46 = vrot.slane %v78_v41, 2 }
  0xc9   :  { %v66_v39 = vrot.slane %v65_v35, 1  ;;  %v70_v40 = vrot.slane %v69_v36, 2 }
  0xca   :  { %v85_v42 = vadd.f32 %v84_v38, %v83_v37  ;;  %v80_v49 = vadd.f32 %v79_v46, %v78_v41 }
  0xcb   :  { %v67_v43 = vadd.f32 %v66_v39, %v65_v35  ;;  %v71_v44 = vadd.f32 %v70_v40, %v69_v36 }
  0xcc   :  { %v86_v47 = vrot.slane %v85_v42, 2  ;;  %v81_v51 = vrot.slane %v80_v49, 1 }
  0xcd   :  { %v72_v45 = vrot.slane %v71_v44, 1  ;;  %125 = vrcp.f32 %v67_v43 }
  0xce   :  { %v87_v50 = vadd.f32 %v86_v47, %v85_v42  ;;  %v82_v54 = vadd.f32 %v81_v51, %v80_v49 }
  0xcf   :  { %v73_v48 = vadd.f32 %v72_v45, %v71_v44 }
  0xd0   :  { %v88_v52 = vrot.slane %v87_v50, 1 }
  0xd1   :  { %127 = vrcp.f32 %v73_v48 }
  0xd2   :  { %v89_v55 = vadd.f32 %v88_v52, %v87_v50 }
  0xd7   :  { %v126_v53 = vpop.eup %125 }
  0xd8   :  { %v92_v57 = vmul.f32 %v126_v53, %v82_v54 }
  0xdb   :  { %v128_v56 = vpop.eup %127 }
  0xdc   :  { %v93_v58 = vmul.f32 %v128_v56, %v89_v55 }
  0xde   :  { %v97_v59 = vsel %vm96_vm1, %v93_v58, %v92_v57 }
  0xdf   :  { %100 = vst.msk [vmem:[#allocation5] sm:$0x3] %vm99_vm2, %v97_v59 }
  0xe0   :  { %162 = shalt.err (!%p159_p12)
}
  0xe1   :  { %s163_s28 = scalar_lea.hbm %s229_s2, 32 }
  0xe2   :  { %p164_p13 = scmp.ne.s32.totalorder %s229_s2, %s163_s28  ;;  %p167_p0 = scmp.lt.u32.totalorder %s163_s28, %s229_s2 }
  0xe4   :  { %p169_p1 = pnand %p167_p0, %p164_p13 }
  0xe6   :  { %172 = shalt.err (!%p169_p1)
}
  0xe7   :  { %110 = dma.vmem_to_hbm [thread:$0]  %s108_s1, 32, %s229_s2, [#allocation4]  }
  0xe8   :  { %175 = dma.done.wait [#allocation4], 32  }
  0xe9   :  { %176 = vsyncadd [#allocation4], 4294967264 }
  0xea   :  { %114 = vsyncpa [#allocation3], 1 }
  0xeb   :  { %115 = vsyncpa [#allocation4], 1 }

</bundles_post_ra>
